<compile_context>
chip_gen: v5e
topology: v5e:2x2
jax: 0.10.0
libtpu: 0.0.40
codegen_flags: <defaults>
</compile_context>

<pallas_src>
import functools

import numpy as np
import jax
import jax.numpy as jnp
from jax.experimental import pallas as pl
from jax.experimental.pallas import tpu as pltpu


# ---------------------------------------------------------------------------
# Kernel
# ---------------------------------------------------------------------------
def _fcu_up_kernel(tokT_ref, w_ref, shift_ref, ut_ref, out_ref):
    # tokT_ref : (Cin, N)            bf16 tokens (cls dropped, channels-first), one batch
    # w_ref    : (tile_c, Cin)       bf16 conv-weight rows for this Cout tile (BN scale folded)
    # shift_ref: (tile_c, 1)         f32 folded conv-bias + BN shift
    # ut_ref   : (N, Hout*Wout)      bf16 transposed bilinear upsampling operator
    # out_ref  : (tile_c, Hout*Wout) out dtype, NCHW element order, lane-dense last dim
    proj = jnp.dot(w_ref[...], tokT_ref[...], preferred_element_type=jnp.float32)
    proj = jnp.maximum(proj + shift_ref[...], 0.0)          # bias/BN shift + ReLU (f32, VPU)
    out = jnp.dot(proj.astype(jnp.bfloat16), ut_ref[...],
                  preferred_element_type=jnp.float32)
    out_ref[...] = out.astype(out_ref.dtype)


# ---------------------------------------------------------------------------
# Host-side helpers
# ---------------------------------------------------------------------------
def _interp_matrix(n_in, n_out):
    """1-D bilinear interpolation matrix, align_corners=True (float32)."""
    src = np.arange(n_out, dtype=np.float64) * (n_in - 1) / max(n_out - 1, 1)
    i0 = np.clip(np.floor(src).astype(np.int64), 0, max(n_in - 2, 0))
    frac = src - i0
    M = np.zeros((n_out, n_in), dtype=np.float32)
    M[np.arange(n_out), i0] += (1.0 - frac)
    M[np.arange(n_out), np.minimum(i0 + 1, n_in - 1)] += frac
    return M


@functools.lru_cache(maxsize=None)
def _upsample_matrix_T(h, w, hout, wout):
    """Transposed 2-D bilinear operator U^T = kron(Uh, Uw)^T, shape (h*w, hout*wout)."""
    Uh = _interp_matrix(h, hout)
    Uw = _interp_matrix(w, wout)
    return np.ascontiguousarray(np.kron(Uh, Uw).T)          # float32


def _fold_params(conv_w, conv_b, gamma, beta, run_mean, run_var, eps):
    """Fold eval-mode BN scale into the 1x1 conv weight; return (Wp bf16, shift f32)."""
    Cout, Cin = conv_w.shape[0], conv_w.shape[1]
    Wc = conv_w.reshape(Cout, Cin).astype(jnp.float32)
    s = gamma.astype(jnp.float32) / jnp.sqrt(run_var.astype(jnp.float32) + eps)
    Wp = (Wc * s[:, None]).astype(jnp.bfloat16)                          # (Cout, Cin)
    shift = ((conv_b.astype(jnp.float32) - run_mean.astype(jnp.float32)) * s
             + beta.astype(jnp.float32)).reshape(Cout, 1)                # (Cout, 1) f32
    return Wp, shift


# ---------------------------------------------------------------------------
# pallas_call builder
# ---------------------------------------------------------------------------
def _build_call(*, B, Cin, Cout, tile_c, N, HWout, out_dtype,
                single_buffer_ut, vmem_limit):
    nct = Cout // tile_c
    out_bytes = np.dtype(out_dtype).itemsize
    # Advisory cost for the XLA scheduler (review item 8).
    flops = 2 * B * Cout * N * (Cin + HWout)
    bytes_accessed = (B * Cin * N * 2 + Cout * Cin * 2 + Cout * 4
                      + N * HWout * 2 + B * Cout * HWout * out_bytes)
    ut_kwargs = dict(pipeline_mode=pl.Buffered(1)) if single_buffer_ut else {}

    return pl.pallas_call(
        _fcu_up_kernel,
        out_shape=jax.ShapeDtypeStruct((B, Cout, HWout), out_dtype),
        grid=(B, nct),
        in_specs=[
            pl.BlockSpec((pl.Squeezed(), Cin, N), lambda b, c: (b, 0, 0)),   # tokT[b]
            pl.BlockSpec((tile_c, Cin), lambda b, c: (c, 0)),                # Wp rows
            pl.BlockSpec((tile_c, 1), lambda b, c: (c, 0)),                  # shift rows
            pl.BlockSpec((N, HWout), lambda b, c: (0, 0), **ut_kwargs),      # U^T (invariant)
        ],
        out_specs=pl.BlockSpec((pl.Squeezed(), tile_c, HWout),
                               lambda b, c: (b, c, 0)),
        compiler_params=pltpu.CompilerParams(
            dimension_semantics=("parallel", "parallel"),
            vmem_limit_bytes=vmem_limit),
        cost_estimate=pl.CostEstimate(flops=flops, transcendentals=0,
                                      bytes_accessed=bytes_accessed),
    )


# ---------------------------------------------------------------------------
# Wrapper
# ---------------------------------------------------------------------------
def fcu_up(x, conv_w, conv_b, gamma, beta, run_mean, run_var, eps=1e-6,
           scale_factor=4, out_dtype=jnp.bfloat16, cout_tile=128):
    B, HW, Cin = x.shape
    H = int(np.sqrt(HW))
    N = H * H
    assert N + 1 == HW, "FCUUp expects HW == H*H + 1 (one cls token)"
    Cout = conv_w.shape[0]
    Hout = Wout = scale_factor * H
    HWout = Hout * Wout

    # Cout tile: must divide Cout and keep the sublane dim a multiple of 8
    # (otherwise fall back to the full Cout, which is always legal).
    tile_c = cout_tile if (Cout % cout_tile == 0 and cout_tile % 8 == 0) else Cout

    Wp, shift = _fold_params(conv_w, conv_b, gamma, beta, run_mean, run_var, eps)

    # Tokens: drop cls, channels-first (tiny XLA transpose), bf16 for the MXU.
    tokT = jnp.transpose(x[:, 1:, :], (0, 2, 1)).astype(jnp.bfloat16)    # (B, Cin, N)
    # Dense bilinear operator, transposed, cached per shape, bf16 on device.
    UT = jnp.asarray(_upsample_matrix_T(H, H, Hout, Wout), dtype=jnp.bfloat16)

    out_bytes = np.dtype(out_dtype).itemsize

    def _vmem_limit(single_ut):
        # Double-buffered blocks + (single- or double-buffered) invariant U^T,
        # 4x headroom for compiler scratch / lane padding, capped under v7x's 64 MiB.
        est = (2 * Cin * N * 2 + 2 * tile_c * Cin * 2 + 2 * tile_c * 4
               + (1 if single_ut else 2) * N * HWout * 2
               + 2 * tile_c * HWout * out_bytes)
        return int(min(64 * 2**20, max(16 * 2**20, 4 * est)))

    common = dict(B=B, Cin=Cin, Cout=Cout, tile_c=tile_c, N=N, HWout=HWout,
                  out_dtype=out_dtype)
    try:
        out = _build_call(**common, single_buffer_ut=True,
                          vmem_limit=_vmem_limit(True))(tokT, Wp, shift, UT)
        out = jax.block_until_ready(out)
    except Exception:
        # Fallback if this JAX build rejects pl.Buffered(1) (single buffering of U^T).
        out = _build_call(**common, single_buffer_ut=False,
                          vmem_limit=_vmem_limit(False))(tokT, Wp, shift, UT)

    # Already in NCHW element order: reshape only (no HBM transpose).
    return out.reshape(B, Cout, Hout, Wout)


# ---------------------------------------------------------------------------
# References for validation
# ---------------------------------------------------------------------------
def _ref_forward(x, conv_w, conv_b, gamma, beta, mean, var, eps=1e-6, sf=4):
    """Pure-numpy float64 reference of the PyTorch forward (eval-mode BN)."""
    x = np.asarray(x, np.float64)
    Wc = np.asarray(conv_w, np.float64)[:, :, 0, 0]
    B, HW, Cin = x.shape
    H = int(np.sqrt(HW))
    Cout = Wc.shape[0]
    tok = x[:, 1:, :]
    proj = tok @ Wc.T + np.asarray(conv_b, np.float64)
    s = np.asarray(gamma, np.float64) / np.sqrt(np.asarray(var, np.float64) + eps)
    y = np.maximum((proj - np.asarray(mean, np.float64)) * s + np.asarray(beta, np.float64), 0.0)
    y = y.reshape(B, H, H, Cout)
    Hout = Wout = sf * H

    def coords(n_in, n_out):
        src = np.arange(n_out) * (n_in - 1) / (n_out - 1)
        i0 = np.clip(np.floor(src).astype(np.int64), 0, n_in - 2)
        return i0, src - i0

    h0, fh = coords(H, Hout)
    w0, fw = coords(H, Wout)
    yh = y[:, h0] * (1 - fh)[None, :, None, None] + y[:, h0 + 1] * fh[None, :, None, None]
    out = yh[:, :, w0] * (1 - fw)[None, None, :, None] + yh[:, :, w0 + 1] * fw[None, None, :, None]
    return out.transpose(0, 3, 1, 2).astype(np.float32)     # NCHW


def _ref_forward_bf16_emulated(x, conv_w, conv_b, gamma, beta, mean, var, eps=1e-6, sf=4):
    """Numpy reference mimicking the kernel's bf16-operand / f32-accumulate arithmetic."""
    B, HW, Cin = x.shape
    H = int(np.sqrt(HW))
    Cout = conv_w.shape[0]
    Hout = Wout = sf * H

    Wp, shift = _fold_params(conv_w, conv_b, gamma, beta, mean, var, eps)
    tokT = jnp.transpose(x[:, 1:, :], (0, 2, 1)).astype(jnp.bfloat16)
    UT = jnp.asarray(_upsample_matrix_T(H, H, Hout, Wout), dtype=jnp.bfloat16)

    Wp_f = np.asarray(Wp.astype(jnp.float32))
    shift_f = np.asarray(shift)
    tokT_f = np.asarray(tokT.astype(jnp.float32))
    UT_f = np.asarray(UT.astype(jnp.float32))

    out = np.zeros((B, Cout, Hout * Wout), np.float32)
    for b in range(B):
        proj = np.maximum(Wp_f @ tokT_f[b] + shift_f, 0.0).astype(np.float32)
        proj_b = np.asarray(jnp.asarray(proj, jnp.bfloat16).astype(jnp.float32))
        out[b] = proj_b @ UT_f
    return out.reshape(B, Cout, Hout, Wout)


# ---------------------------------------------------------------------------
# Self-test
# ---------------------------------------------------------------------------
if __name__ == "__main__":
    B, inplanes, outplanes, H = 2, 32, 16, 4
    HW = H * H + 1                                           # +1 class token

    key = jax.random.PRNGKey(0)
    k = jax.random.split(key, 7)
    x = jax.random.normal(k[0], (B, HW, inplanes), jnp.float32)
    conv_w = jax.random.normal(k[1], (outplanes, inplanes, 1, 1), jnp.float32) * 0.1
    conv_b = jax.random.normal(k[2], (outplanes,), jnp.float32) * 0.1
    gamma = 1.0 + 0.1 * jax.random.normal(k[3], (outplanes,), jnp.float32)
    beta = 0.1 * jax.random.normal(k[4], (outplanes,), jnp.float32)
    run_mean = 0.1 * jax.random.normal(k[5], (outplanes,), jnp.float32)
    run_var = jax.random.uniform(k[6], (outplanes,), jnp.float32, minval=0.5, maxval=1.5)

    # cout_tile=8 exercises the two-axis (B, Cout//tile_c) grid at this small size.
    out_bf16 = jax.block_until_ready(
        fcu_up(x, conv_w, conv_b, gamma, beta, run_mean, run_var, cout_tile=8))
    assert out_bf16.shape == (B, outplanes, 4 * H, 4 * H), out_bf16.shape
    assert out_bf16.dtype == jnp.bfloat16, out_bf16.dtype

    out_f32 = jax.block_until_ready(
        fcu_up(x, conv_w, conv_b, gamma, beta, run_mean, run_var,
               out_dtype=jnp.float32, cout_tile=8))
    out_f32_np = np.asarray(out_f32)
    out_bf16_np = np.asarray(out_bf16.astype(jnp.float32))

    # (1) Tight: f32-output kernel vs a reference using the exact same bf16-rounded
    #     operands (only difference is f32 accumulation order).
    ref_bf16 = _ref_forward_bf16_emulated(x, conv_w, conv_b, gamma, beta, run_mean, run_var)
    np.testing.assert_allclose(out_f32_np, ref_bf16, rtol=1e-3, atol=1e-3)

    # (2) bf16-output kernel matches the f32-output kernel up to one output rounding.
    np.testing.assert_allclose(out_bf16_np, out_f32_np, rtol=1.5e-2, atol=1.5e-2)

    # (3) Loose: exact (float64) PyTorch-module semantics; slack covers the intentional
    #     bf16 quantization of MXU operands and (for the default path) the bf16 output.
    ref = _ref_forward(x, conv_w, conv_b, gamma, beta, run_mean, run_var)
    np.testing.assert_allclose(out_f32_np, ref, rtol=5e-2, atol=5e-2)
    np.testing.assert_allclose(out_bf16_np, ref, rtol=5e-2, atol=5e-2)

    print("KERNEL_OK")
</pallas_src>

<mosaic_0001>
module attributes {stable_mosaic.version = 11 : i64} {
  func.func @_fcu_up_kernel(%arg0: i32, %arg1: i32, %arg2: memref<1x32x16xbf16, #tpu.memory_space<vmem>>, %arg3: memref<8x32xbf16, #tpu.memory_space<vmem>>, %arg4: memref<8x1xf32, #tpu.memory_space<vmem>>, %arg5: memref<16x256xbf16, #tpu.memory_space<vmem>>, %arg6: memref<1x8x256xbf16, #tpu.memory_space<vmem>>) attributes {dimension_semantics = [#tpu.dimension_semantics<parallel>, #tpu.dimension_semantics<parallel>], iteration_bounds = array<i64: 2, 2>, scalar_prefetch = 0 : i64, scratch_operands = 0 : i64, tpu.core_type = #tpu.core_type<tc>, window_params = [{transform_indices = @transform_0, window_bounds = array<i64: 1, 32, 16>}, {transform_indices = @transform_1, window_bounds = array<i64: 8, 32>}, {transform_indices = @transform_2, window_bounds = array<i64: 8, 1>}, {pipeline_mode = #tpu.pipeline_mode<synchronous>, transform_indices = @transform_3, window_bounds = array<i64: 16, 256>}, {transform_indices = @transform_4, window_bounds = array<i64: 1, 8, 256>}]} {
    %c0 = arith.constant 0 : index
    %c0_0 = arith.constant 0 : index
    %0 = vector.load %arg3[%c0, %c0_0] : memref<8x32xbf16, #tpu.memory_space<vmem>>, vector<8x32xbf16>
    %c0_1 = arith.constant 0 : index
    %c0_2 = arith.constant 0 : index
    %c0_3 = arith.constant 0 : index
    %1 = vector.load %arg2[%c0_1, %c0_2, %c0_3] : memref<1x32x16xbf16, #tpu.memory_space<vmem>>, vector<1x32x16xbf16>
    %2 = vector.shape_cast %1 : vector<1x32x16xbf16> to vector<32x16xbf16>
    %cst = arith.constant dense<0.000000e+00> : vector<8x16xf32>
    %3 = tpu.matmul %0, %2, %cst {dimension_numbers = #tpu.dot_dimension_numbers<[1], [0], [0], [1], [0, 0, 1, 1], [], []>} : vector<8x32xbf16>, vector<32x16xbf16>, vector<8x16xf32> -> vector<8x16xf32>
    %c0_4 = arith.constant 0 : index
    %c0_5 = arith.constant 0 : index
    %4 = vector.load %arg4[%c0_4, %c0_5] : memref<8x1xf32, #tpu.memory_space<vmem>>, vector<8x1xf32>
    %5 = vector.broadcast %4 : vector<8x1xf32> to vector<8x16xf32>
    %6 = arith.addf %3, %5 : vector<8x16xf32>
    %cst_6 = arith.constant 0.000000e+00 : f32
    %7 = vector.broadcast %cst_6 : f32 to vector<8x16xf32>
    %8 = arith.maximumf %6, %7 : vector<8x16xf32>
    %9 = arith.truncf %8 : vector<8x16xf32> to vector<8x16xbf16>
    %c0_7 = arith.constant 0 : index
    %c0_8 = arith.constant 0 : index
    %10 = vector.load %arg5[%c0_7, %c0_8] : memref<16x256xbf16, #tpu.memory_space<vmem>>, vector<16x256xbf16>
    %cst_9 = arith.constant dense<0.000000e+00> : vector<8x256xf32>
    %11 = tpu.matmul %9, %10, %cst_9 {dimension_numbers = #tpu.dot_dimension_numbers<[1], [0], [0], [1], [0, 0, 1, 1], [], []>} : vector<8x16xbf16>, vector<16x256xbf16>, vector<8x256xf32> -> vector<8x256xf32>
    %12 = arith.truncf %11 : vector<8x256xf32> to vector<8x256xbf16>
    %c0_10 = arith.constant 0 : index
    %c0_11 = arith.constant 0 : index
    %c0_12 = arith.constant 0 : index
    %13 = vector.load %arg6[%c0_10, %c0_11, %c0_12] : memref<1x8x256xbf16, #tpu.memory_space<vmem>>, vector<1x8x256xbf16>
    %14 = vector.shape_cast %13 : vector<1x8x256xbf16> to vector<8x256xbf16>
    %15 = vector.shape_cast %12 : vector<8x256xbf16> to vector<1x8x256xbf16>
    tpu.vector_store %arg6[%c0_10, %c0_11, %c0_12], %15 {strides = array<i32>} : memref<1x8x256xbf16, #tpu.memory_space<vmem>>, vector<1x8x256xbf16>,
    return
  }
  func.func @transform_0(%arg0: i32, %arg1: i32) -> (i32, i32, i32) {
    %c0_i32 = arith.constant 0 : i32
    %c0_i32_0 = arith.constant 0 : i32
    %c0_i32_1 = arith.constant 0 : i32
    return %arg0, %c0_i32, %c0_i32_0 : i32, i32, i32
  }
  func.func @transform_1(%arg0: i32, %arg1: i32) -> (i32, i32) {
    %c0_i32 = arith.constant 0 : i32
    %c0_i32_0 = arith.constant 0 : i32
    return %arg1, %c0_i32 : i32, i32
  }
  func.func @transform_2(%arg0: i32, %arg1: i32) -> (i32, i32) {
    %c0_i32 = arith.constant 0 : i32
    %c0_i32_0 = arith.constant 0 : i32
    return %arg1, %c0_i32 : i32, i32
  }
  func.func @transform_3(%arg0: i32, %arg1: i32) -> (i32, i32) {
    %c0_i32 = arith.constant 0 : i32
    %c0_i32_0 = arith.constant 0 : i32
    %c0_i32_1 = arith.constant 0 : i32
    return %c0_i32, %c0_i32_0 : i32, i32
  }
  func.func @transform_4(%arg0: i32, %arg1: i32) -> (i32, i32, i32) {
    %c0_i32 = arith.constant 0 : i32
    %c0_i32_0 = arith.constant 0 : i32
    return %arg0, %arg1, %c0_i32 : i32, i32, i32
  }
}

module attributes {stable_mosaic.version = 11 : i64} {
  func.func @_fcu_up_kernel(%arg0: i32, %arg1: i32, %arg2: memref<1x32x16xbf16, #tpu.memory_space<vmem>>, %arg3: memref<8x32xbf16, #tpu.memory_space<vmem>>, %arg4: memref<8x1xf32, #tpu.memory_space<vmem>>, %arg5: memref<16x256xbf16, #tpu.memory_space<vmem>>, %arg6: memref<1x8x256xbf16, #tpu.memory_space<vmem>>) attributes {dimension_semantics = [#tpu.dimension_semantics<parallel>, #tpu.dimension_semantics<parallel>], iteration_bounds = array<i64: 2, 2>, scalar_prefetch = 0 : i64, scratch_operands = 0 : i64, tpu.core_type = #tpu.core_type<tc>, window_params = [{transform_indices = @transform_0, window_bounds = array<i64: 1, 32, 16>}, {transform_indices = @transform_1, window_bounds = array<i64: 8, 32>}, {transform_indices = @transform_2, window_bounds = array<i64: 8, 1>}, {pipeline_mode = #tpu.pipeline_mode<synchronous>, transform_indices = @transform_3, window_bounds = array<i64: 16, 256>}, {transform_indices = @transform_4, window_bounds = array<i64: 1, 8, 256>}]} {
    %c0 = arith.constant 0 : index
    %c0_0 = arith.constant 0 : index
    %0 = vector.load %arg3[%c0, %c0_0] : memref<8x32xbf16, #tpu.memory_space<vmem>>, vector<8x32xbf16>
    %c0_1 = arith.constant 0 : index
    %c0_2 = arith.constant 0 : index
    %c0_3 = arith.constant 0 : index
    %1 = vector.load %arg2[%c0_1, %c0_2, %c0_3] : memref<1x32x16xbf16, #tpu.memory_space<vmem>>, vector<1x32x16xbf16>
    %2 = vector.shape_cast %1 : vector<1x32x16xbf16> to vector<32x16xbf16>
    %cst = arith.constant dense<0.000000e+00> : vector<8x16xf32>
    %3 = tpu.matmul %0, %2, %cst {dimension_numbers = #tpu.dot_dimension_numbers<[1], [0], [0], [1], [0, 0, 1, 1], [], []>} : vector<8x32xbf16>, vector<32x16xbf16>, vector<8x16xf32> -> vector<8x16xf32>
    %c0_4 = arith.constant 0 : index
    %c0_5 = arith.constant 0 : index
    %4 = vector.load %arg4[%c0_4, %c0_5] : memref<8x1xf32, #tpu.memory_space<vmem>>, vector<8x1xf32>
    %5 = vector.broadcast %4 : vector<8x1xf32> to vector<8x16xf32>
    %6 = arith.addf %3, %5 : vector<8x16xf32>
    %cst_6 = arith.constant 0.000000e+00 : f32
    %7 = vector.broadcast %cst_6 : f32 to vector<8x16xf32>
    %8 = arith.maximumf %6, %7 : vector<8x16xf32>
    %9 = arith.truncf %8 : vector<8x16xf32> to vector<8x16xbf16>
    %c0_7 = arith.constant 0 : index
    %c0_8 = arith.constant 0 : index
    %10 = vector.load %arg5[%c0_7, %c0_8] : memref<16x256xbf16, #tpu.memory_space<vmem>>, vector<16x256xbf16>
    %cst_9 = arith.constant dense<0.000000e+00> : vector<8x256xf32>
    %11 = tpu.matmul %9, %10, %cst_9 {dimension_numbers = #tpu.dot_dimension_numbers<[1], [0], [0], [1], [0, 0, 1, 1], [], []>} : vector<8x16xbf16>, vector<16x256xbf16>, vector<8x256xf32> -> vector<8x256xf32>
    %12 = arith.truncf %11 : vector<8x256xf32> to vector<8x256xbf16>
    %c0_10 = arith.constant 0 : index
    %c0_11 = arith.constant 0 : index
    %c0_12 = arith.constant 0 : index
    %13 = vector.load %arg6[%c0_10, %c0_11, %c0_12] : memref<1x8x256xbf16, #tpu.memory_space<vmem>>, vector<1x8x256xbf16>
    %14 = vector.shape_cast %13 : vector<1x8x256xbf16> to vector<8x256xbf16>
    %15 = vector.shape_cast %12 : vector<8x256xbf16> to vector<1x8x256xbf16>
    tpu.vector_store %arg6[%c0_10, %c0_11, %c0_12], %15 {strides = array<i32>} : memref<1x8x256xbf16, #tpu.memory_space<vmem>>, vector<1x8x256xbf16>,
    return
  }
  func.func @transform_0(%arg0: i32, %arg1: i32) -> (i32, i32, i32) {
    %c0_i32 = arith.constant 0 : i32
    %c0_i32_0 = arith.constant 0 : i32
    %c0_i32_1 = arith.constant 0 : i32
    return %arg0, %c0_i32, %c0_i32_0 : i32, i32, i32
  }
  func.func @transform_1(%arg0: i32, %arg1: i32) -> (i32, i32) {
    %c0_i32 = arith.constant 0 : i32
    %c0_i32_0 = arith.constant 0 : i32
    return %arg1, %c0_i32 : i32, i32
  }
  func.func @transform_2(%arg0: i32, %arg1: i32) -> (i32, i32) {
    %c0_i32 = arith.constant 0 : i32
    %c0_i32_0 = arith.constant 0 : i32
    return %arg1, %c0_i32 : i32, i32
  }
  func.func @transform_3(%arg0: i32, %arg1: i32) -> (i32, i32) {
    %c0_i32 = arith.constant 0 : i32
    %c0_i32_0 = arith.constant 0 : i32
    %c0_i32_1 = arith.constant 0 : i32
    return %c0_i32, %c0_i32_0 : i32, i32
  }
  func.func @transform_4(%arg0: i32, %arg1: i32) -> (i32, i32, i32) {
    %c0_i32 = arith.constant 0 : i32
    %c0_i32_0 = arith.constant 0 : i32
    return %arg0, %arg1, %c0_i32 : i32, i32, i32
  }
}

</mosaic_0001>

<bundles_post_ra>
// kernel: tpu_custom_call.1
= control target key start
LH: loop header
LB: loop body
LE: loop exit
PB: predicated region body
PF: predicated region fallthrough
CT: control target
= control target key end

     0   :  { %9 = vsyncpa [#allocation3], 0  ;;  %s822_s0 = inlined_call_operand.vmem [shape: bf16[2,32,16], index: 0, kind: input, shape index: {}]   ;;  %s823_s1 = inlined_call_operand.vmem [shape: bf16[16,32], index: 1, kind: input, shape index: {}]   ;;  %s824_s2 = inlined_call_operand.vmem [shape: f32[16,1], index: 2, kind: input, shape index: {}]   ;;  %s825_s3 = inlined_call_operand.vmem [shape: bf16[16,256], index: 3, kind: input, shape index: {}]   ;;  %s826_s4 = inlined_call_operand.hbm [shape: bf16[2,16,256], index: 4, kind: output, shape index: {}]  }
   0x1   :  { %11 = vsyncpa [#allocation3 + $0x1], 0  ;;  %s682_s15 = smov 0   ;;  %s684_s16 = smov 0  }
   0x2   :  { %s686_s17 = smov 0   ;;  %s688_s18 = smov 0  }
   0x3   :  { %s690_s19 = smov 0   ;;  %s692_s20 = smov 0  }
   0x4   :  { %s694_s21 = smov 0   ;;  %s696_s22 = smov 0  }
   0x5 LB: > { %s447_s23 = sadd.s32 4294967295, %s654_s22   ;;  %s448_s24 = sadd.s32 4294967294, %s654_s22   ;;  %s654_s22 = sphi %s696_s22, %s17_s22   ;;  %s650_s21 = sphi %s694_s21, %s838_s21   ;;  %s646_s20 = sphi %s692_s20, %s837_s20   ;;  %s642_s19 = sphi %s690_s19, %s836_s19   ;;  %s638_s18 = sphi %s688_s18, %s835_s18   ;;  %s634_s17 = sphi %s686_s17, %s834_s17   ;;  %s630_s16 = sphi %s684_s16, %s833_s16   ;;  %s626_s15 = sphi %s682_s15, %s832_s15  }
   0x6   : > { %s26_s25 = sadd.s32 1, %s646_s20  ;;  %s29_s26 = sadd.s32 1, %s650_s21 }
   0x7   : > { %p27_p0 = scmp.ge.s32.totalorder %s26_s25, 2  ;;  %p147_p1 = scmp.ne.s32.totalorder %s634_s17, %s630_s16 }
   0x8   : > { %p148_p2 = scmp.eq.s32.totalorder %s447_s23, 3  ;;  %p153_p5 = scmp.ne.s32.totalorder %s630_s16, %s626_s15 }
   0x9   : > { %s840_s25 = smov (%p27_p0, %s26_s25), 0  ;;  %s842_s26 = smov (!%p27_p0, %s29_s26), %s650_s21 }
   0xa   : > { %s133_s27 = ssub.s32 %s646_s20, %s840_s25  ;;  %p733_p3 = por %p148_p2, %p147_p1 }
   0xb   : > { %p31_p4 = scmp.ge.s32.totalorder %s842_s26, 2  ;;  %p154_p6 = scmp.eq.s32.totalorder %s448_s24, 3 }
   0xc   : > { %p451_p7 = scmp.ge.s32.totalorder %s654_s22, 1  ;;  %p197_p9 = scmp.lt.s32.totalorder %s654_s22, 5 }
   0xd   : > { %s844_s26 = smov (%p31_p4, %s842_s26), 0  ;;  %p742_p8 = por %p154_p6, %p153_p5 }
   0xe   : > { %829 = sst [smem:[#allocation5_spill]] %s844_s26  ;;  %s132_s30 = ssub.s32 %s650_s21, %s844_s26 }
   0xf   : > { %s137_s5 = sadd.s32 1, %s634_s17  ;;  %s134_s6 = sor.u32 %s133_s27, %s132_s30 }
  0x10   : > { %p198_p10 = pnand %p451_p7, %p197_p9  ;;  %p135_p11 = scmp.eq.s32.totalorder %s134_s6, 0 }
  0x11   : > { %p231_p12 = scmp.lt.s32.totalorder (!%p198_p10), %s642_s19, 1  ;;  %p236_p13 = scmp.lt.s32.totalorder (!%p198_p10), %s638_s18, 1 }
  0x12   : > { %s751_s7 = scalar_select %p135_p11, %s634_s17, %s137_s5  }
  0x13   : > { %201 = sbr.rel (%p198_p10) target bundleno = 308 (0x134), region = 36  ;;  %s478_s24 = sshll.u32 (!%p198_p10), %s642_s19, 2 }
  0x18   : > { %v656_v0 = vmov 0   ;;  %s232_s8 = scalar_select %p231_p12, %s642_s19, 1  ;;  %vm268_vm0 = vcmask 261120   ;;  %v468_v5 = vld [vmem:[%s825_s3] sm:$0xf]  ;;  %vm299_vm1 = vcmask 130048  }
  0x19   : > { %559 = vset.pattern.permute.xlu0 %v656_v0  ;;  %s237_s9 = scalar_select %p236_p13, %s638_s18, 1  ;;  %v486_v6 = vld [vmem:[%s825_s3 + $0x4] sm:$0xf0]  ;;  %v485_v7 = vld [vmem:[%s825_s3 + $0x4] sm:$0xf] }
  0x1a   : > { %s482_s10 = sshll.u32 %s232_s8, 4  ;;  %v469_v8 = vor.u32 %v486_v6, %v468_v5  ;;  %v470_v9 = vld [vmem:[%s825_s3 + $0x8] sm:$0xf0] }
  0x1b   : > { %s235_s13 = scalar_lea.vmem %s822_s0, %s482_s10  ;;  %s455_s14 = sshll.u32 %s237_s9, 2  ;;  %v473_v10 = vor.u32 %v485_v7, %v470_v9 }
  0x1c   : > { %v484_v1 = vld [vmem:[%s235_s13 + $0x8] sm:$0xff]  ;;  %s456_s23 = sshll.u32 %s237_s9, 3  ;;  %v483_v2 = vld [vmem:[%s235_s13] sm:$0xff]  ;;  %s239_s26 = scalar_lea.vmem %s823_s1, %s455_s14  ;;  %310 = vmatpush.bf16.msra.mxu1 %v469_v8 }
  0x1d   : > { %s243_s30 = scalar_lea.vmem %s824_s2, %s456_s23  ;;  %278 = vmatpush.bf16.msra.mxu0 %v484_v1  ;;  %v245_v4 = vld [vmem:[%s239_s26] sm:$0xf]  ;;  %323 = vmatpush.bf16.msra.mxu2 %v473_v10  ;;  %s477_s26 = sshll.u32 %s638_s18, 1 }
  0x1e   : > { %v250_v3 = vld [vmem:[%s243_s30] sm:$0xff]  ;;  %s343_s27 = sadd.s32 %s478_s24, %s477_s26  ;;  %s228_s30 = sand.u32 1, %s630_s16  }
  0x1f   : > { %253 = vperm.xlu0 %559, %v250_v3   ;;  %s479_s5 = sshll.u32 %s343_s27, 2  ;;  %s452_s6 = sshll.u32 %s228_s30, 3 }
  0x20   : > { %s345_s9 = scalar_lea.hbm %s826_s4, %s479_s5  ;;  %s230_s11 = scalar_lea.vmem [#allocation2], %s452_s6 }
  0x21   : > { %279 = vmatpush.bf16.msra.mxu0 %v483_v2  ;;  %s347_s12 = sshll.u32 %s230_s11, 4  ;;  %s349_s13 = sshll.u32 %s345_s9, 4  ;;  %s348_s12 = int_to_ptr.vmem [resolvable:$true] %s347_s12  ;;  %s350_s13 = int_to_ptr.hbm [resolvable:$true] %s349_s13 }
  0x22   : > { %s332_s18 = scalar_lea.sflag [#allocation3], %s228_s30  ;;  %s574_s19 = sshra.s32 %s350_s13, 4  ;;  %s575_s19 = int_to_ptr.hbm [resolvable:$true] %s574_s19 }
  0x23   : > { %s576_s14 = scalar_lea.hbm %s575_s19, 8  ;;  %s580_s24 = scalar_lea.hbm %s826_s4, 32 }
  0x24   : > { %465 = vmatmul.msk.bf16.vlgmr.msra.gmra.mxu0 %vm268_vm0, %v245_v4  ;;  %p577_p0 = scmp.ne.s32.totalorder %s575_s19, %s576_s14  ;;  %p581_p4 = scmp.lt.s32.totalorder %s575_s19, %s826_s4 }
  0x25   : > { %p582_p5 = scmp.lt.s32.totalorder %s580_s24, %s576_s14 }
  0x26   : > { %p578_p1 = pnand %p577_p0, %p733_p3 }
  0x27   : > { %p583_p6 = por %p582_p5, %p581_p4 }
  0x28   : > { %p579_p2 = pneg %p578_p1 }
  0x2a   : > { %p584_p7 = pnand %p583_p6, %p579_p2 }
  0x91   : > { %v254_v11 = vpop.permute.xlu0 %253 }
  0xa1   : > { %v281_v12 = vpop.f32.mrf.mxu0 }
  0xa2   : > { %v282_v13 = vadd.f32 %v281_v12, %v254_v11 }
  0xa4   : > { %v285_v14 = vmax.f32 %v282_v13, 0.0 }
  0xa6   : > { %v286_v15 = vpack.c.bf16 %v285_v14, %v285_v14 }
  0xa8   : > { %474 = vmatmul.msk.bf16.vlgmr.msra.gmra.mxu1 %vm299_vm1, %v286_v15  ;;  %475 = vmatmul.msk.bf16.vlgmr.msra.gmra.mxu2 %vm299_vm1, %v286_v15 }
  0xa9   : > { %v283_v16 = vpop.f32.mrf.mxu0 }
 0x125   : > { %v312_v17 = vpop.f32.mrf.mxu1 }
 0x12b   : > { %v325_v18 = vpop.f32.mrf.mxu2 }
 0x12c   : > { %v329_v19 = vpack.c.bf16 %v325_v18, %v312_v17 }
 0x12d   : > { %v314_v20 = vpop.f32.mrf.mxu1 }
 0x12e   : > { %330 = vst [vmem:[%s230_s11] sm:$0xff] %v329_v19 }
 0x12f   : > { %587 = shalt.err (!%p584_p7)
}
 0x130   : > { %487 = dma.vmem_to_hbm [thread:$0]  (%p733_p3), %s348_s12, 128, %s350_s13, %s332_s18  }
 0x133   : > { %v327_v21 = vpop.f32.mrf.mxu2 }
 0x134 PF: > { %p493_p9 = scmp.ge.s32.totalorder %s654_s22, 2  ;;  %s361_s30 = sand.u32 1, %s626_s15  }
 0x135   : > { %s362_s6 = scalar_lea.sflag [#allocation3], %s361_s30 }
 0x136   : > { %p490_p10 = pnand %p493_p9, %p742_p8 }
 0x138   : > { %p491_p11 = pneg %p490_p10 }
 0x13a   : > { %621 = dma.done.wait (%p491_p11), %s362_s6, 128  }
 0x13b   : > { %623 = vsyncadd (%p491_p11), %s362_s6, 4294967168  ;;  %s17_s22 = sadd.s32 1, %s654_s22   ;;  %s831_s28 = sld [smem:[#allocation5_spill]] }
 0x13c   : > { %p14_p12 = scmp.ge.s32.totalorder %s17_s22, 6   ;;  %s832_s15 = smov %s630_s16 }
 0x13d   : > { %s833_s16 = smov %s634_s17  ;;  %s834_s17 = smov %s751_s7 }
 0x13e   : > { %s835_s18 = smov %s646_s20  ;;  %s836_s19 = smov %s650_s21 }
 0x13f   : > { %s837_s20 = smov %s840_s25  ;;  %16 = sbr.rel (!%p14_p12) target bundleno = 5 (0x5), region = 77 }
 0x141   : > { %s838_s21 = smov %s831_s28 }
 0x144   :  { %368 = vsyncpa [#allocation3], 1 }
 0x145   :  { %370 = vsyncpa [#allocation3 + $0x1], 1 }

// kernel: tpu_custom_call.1
= control target key start
LH: loop header
LB: loop body
LE: loop exit
PB: predicated region body
PF: predicated region fallthrough
CT: control target
= control target key end

     0   :  { %9 = vsyncpa [#allocation3], 0  ;;  %s822_s0 = inlined_call_operand.vmem [shape: bf16[2,32,16], index: 0, kind: input, shape index: {}]   ;;  %s823_s1 = inlined_call_operand.vmem [shape: bf16[16,32], index: 1, kind: input, shape index: {}]   ;;  %s824_s2 = inlined_call_operand.vmem [shape: f32[16,1], index: 2, kind: input, shape index: {}]   ;;  %s825_s3 = inlined_call_operand.vmem [shape: bf16[16,256], index: 3, kind: input, shape index: {}]   ;;  %s826_s4 = inlined_call_operand.hbm [shape: bf16[2,16,256], index: 4, kind: output, shape index: {}]  }
   0x1   :  { %11 = vsyncpa [#allocation3 + $0x1], 0  ;;  %s682_s15 = smov 0   ;;  %s684_s16 = smov 0  }
   0x2   :  { %s686_s17 = smov 0   ;;  %s688_s18 = smov 0  }
   0x3   :  { %s690_s19 = smov 0   ;;  %s692_s20 = smov 0  }
   0x4   :  { %s694_s21 = smov 0   ;;  %s696_s22 = smov 0  }
   0x5 LB: > { %s447_s23 = sadd.s32 4294967295, %s654_s22   ;;  %s448_s24 = sadd.s32 4294967294, %s654_s22   ;;  %s654_s22 = sphi %s696_s22, %s17_s22   ;;  %s650_s21 = sphi %s694_s21, %s838_s21   ;;  %s646_s20 = sphi %s692_s20, %s837_s20   ;;  %s642_s19 = sphi %s690_s19, %s836_s19   ;;  %s638_s18 = sphi %s688_s18, %s835_s18   ;;  %s634_s17 = sphi %s686_s17, %s834_s17   ;;  %s630_s16 = sphi %s684_s16, %s833_s16   ;;  %s626_s15 = sphi %s682_s15, %s832_s15  }
   0x6   : > { %s26_s25 = sadd.s32 1, %s646_s20  ;;  %s29_s26 = sadd.s32 1, %s650_s21 }
   0x7   : > { %p27_p0 = scmp.ge.s32.totalorder %s26_s25, 2  ;;  %p147_p1 = scmp.ne.s32.totalorder %s634_s17, %s630_s16 }
   0x8   : > { %p148_p2 = scmp.eq.s32.totalorder %s447_s23, 3  ;;  %p153_p5 = scmp.ne.s32.totalorder %s630_s16, %s626_s15 }
   0x9   : > { %s840_s25 = smov (%p27_p0, %s26_s25), 0  ;;  %s842_s26 = smov (!%p27_p0, %s29_s26), %s650_s21 }
   0xa   : > { %s133_s27 = ssub.s32 %s646_s20, %s840_s25  ;;  %p733_p3 = por %p148_p2, %p147_p1 }
   0xb   : > { %p31_p4 = scmp.ge.s32.totalorder %s842_s26, 2  ;;  %p154_p6 = scmp.eq.s32.totalorder %s448_s24, 3 }
   0xc   : > { %p451_p7 = scmp.ge.s32.totalorder %s654_s22, 1  ;;  %p197_p9 = scmp.lt.s32.totalorder %s654_s22, 5 }
   0xd   : > { %s844_s26 = smov (%p31_p4, %s842_s26), 0  ;;  %p742_p8 = por %p154_p6, %p153_p5 }
   0xe   : > { %829 = sst [smem:[#allocation5_spill]] %s844_s26  ;;  %s132_s30 = ssub.s32 %s650_s21, %s844_s26 }
   0xf   : > { %s137_s5 = sadd.s32 1, %s634_s17  ;;  %s134_s6 = sor.u32 %s133_s27, %s132_s30 }
  0x10   : > { %p198_p10 = pnand %p451_p7, %p197_p9  ;;  %p135_p11 = scmp.eq.s32.totalorder %s134_s6, 0 }
  0x11   : > { %p231_p12 = scmp.lt.s32.totalorder (!%p198_p10), %s642_s19, 1  ;;  %p236_p13 = scmp.lt.s32.totalorder (!%p198_p10), %s638_s18, 1 }
  0x12   : > { %s751_s7 = scalar_select %p135_p11, %s634_s17, %s137_s5  }
  0x13   : > { %201 = sbr.rel (%p198_p10) target bundleno = 308 (0x134), region = 36  ;;  %s478_s24 = sshll.u32 (!%p198_p10), %s642_s19, 2 }
  0x18   : > { %v656_v0 = vmov 0   ;;  %s232_s8 = scalar_select %p231_p12, %s642_s19, 1  ;;  %vm268_vm0 = vcmask 261120   ;;  %v468_v5 = vld [vmem:[%s825_s3] sm:$0xf]  ;;  %vm299_vm1 = vcmask 130048  }
  0x19   : > { %559 = vset.pattern.permute.xlu0 %v656_v0  ;;  %s237_s9 = scalar_select %p236_p13, %s638_s18, 1  ;;  %v486_v6 = vld [vmem:[%s825_s3 + $0x4] sm:$0xf0]  ;;  %v485_v7 = vld [vmem:[%s825_s3 + $0x4] sm:$0xf] }
  0x1a   : > { %s482_s10 = sshll.u32 %s232_s8, 4  ;;  %v469_v8 = vor.u32 %v486_v6, %v468_v5  ;;  %v470_v9 = vld [vmem:[%s825_s3 + $0x8] sm:$0xf0] }
  0x1b   : > { %s235_s13 = scalar_lea.vmem %s822_s0, %s482_s10  ;;  %s455_s14 = sshll.u32 %s237_s9, 2  ;;  %v473_v10 = vor.u32 %v485_v7, %v470_v9 }
  0x1c   : > { %v484_v1 = vld [vmem:[%s235_s13 + $0x8] sm:$0xff]  ;;  %s456_s23 = sshll.u32 %s237_s9, 3  ;;  %v483_v2 = vld [vmem:[%s235_s13] sm:$0xff]  ;;  %s239_s26 = scalar_lea.vmem %s823_s1, %s455_s14  ;;  %310 = vmatpush.bf16.msra.mxu1 %v469_v8 }
  0x1d   : > { %s243_s30 = scalar_lea.vmem %s824_s2, %s456_s23  ;;  %278 = vmatpush.bf16.msra.mxu0 %v484_v1  ;;  %v245_v4 = vld [vmem:[%s239_s26] sm:$0xf]  ;;  %323 = vmatpush.bf16.msra.mxu2 %v473_v10  ;;  %s477_s26 = sshll.u32 %s638_s18, 1 }
  0x1e   : > { %v250_v3 = vld [vmem:[%s243_s30] sm:$0xff]  ;;  %s343_s27 = sadd.s32 %s478_s24, %s477_s26  ;;  %s228_s30 = sand.u32 1, %s630_s16  }
  0x1f   : > { %253 = vperm.xlu0 %559, %v250_v3   ;;  %s479_s5 = sshll.u32 %s343_s27, 2  ;;  %s452_s6 = sshll.u32 %s228_s30, 3 }
  0x20   : > { %s345_s9 = scalar_lea.hbm %s826_s4, %s479_s5  ;;  %s230_s11 = scalar_lea.vmem [#allocation2], %s452_s6 }
  0x21   : > { %279 = vmatpush.bf16.msra.mxu0 %v483_v2  ;;  %s347_s12 = sshll.u32 %s230_s11, 4  ;;  %s349_s13 = sshll.u32 %s345_s9, 4  ;;  %s348_s12 = int_to_ptr.vmem [resolvable:$true] %s347_s12  ;;  %s350_s13 = int_to_ptr.hbm [resolvable:$true] %s349_s13 }
  0x22   : > { %s332_s18 = scalar_lea.sflag [#allocation3], %s228_s30  ;;  %s574_s19 = sshra.s32 %s350_s13, 4  ;;  %s575_s19 = int_to_ptr.hbm [resolvable:$true] %s574_s19 }
  0x23   : > { %s576_s14 = scalar_lea.hbm %s575_s19, 8  ;;  %s580_s24 = scalar_lea.hbm %s826_s4, 32 }
  0x24   : > { %465 = vmatmul.msk.bf16.vlgmr.msra.gmra.mxu0 %vm268_vm0, %v245_v4  ;;  %p577_p0 = scmp.ne.s32.totalorder %s575_s19, %s576_s14  ;;  %p581_p4 = scmp.lt.s32.totalorder %s575_s19, %s826_s4 }
  0x25   : > { %p582_p5 = scmp.lt.s32.totalorder %s580_s24, %s576_s14 }
  0x26   : > { %p578_p1 = pnand %p577_p0, %p733_p3 }
  0x27   : > { %p583_p6 = por %p582_p5, %p581_p4 }
  0x28   : > { %p579_p2 = pneg %p578_p1 }
  0x2a   : > { %p584_p7 = pnand %p583_p6, %p579_p2 }
  0x91   : > { %v254_v11 = vpop.permute.xlu0 %253 }
  0xa1   : > { %v281_v12 = vpop.f32.mrf.mxu0 }
  0xa2   : > { %v282_v13 = vadd.f32 %v281_v12, %v254_v11 }
  0xa4   : > { %v285_v14 = vmax.f32 %v282_v13, 0.0 }
  0xa6   : > { %v286_v15 = vpack.c.bf16 %v285_v14, %v285_v14 }
  0xa8   : > { %474 = vmatmul.msk.bf16.vlgmr.msra.gmra.mxu1 %vm299_vm1, %v286_v15  ;;  %475 = vmatmul.msk.bf16.vlgmr.msra.gmra.mxu2 %vm299_vm1, %v286_v15 }
  0xa9   : > { %v283_v16 = vpop.f32.mrf.mxu0 }
 0x125   : > { %v312_v17 = vpop.f32.mrf.mxu1 }
 0x12b   : > { %v325_v18 = vpop.f32.mrf.mxu2 }
 0x12c   : > { %v329_v19 = vpack.c.bf16 %v325_v18, %v312_v17 }
 0x12d   : > { %v314_v20 = vpop.f32.mrf.mxu1 }
 0x12e   : > { %330 = vst [vmem:[%s230_s11] sm:$0xff] %v329_v19 }
 0x12f   : > { %587 = shalt.err (!%p584_p7)
}
 0x130   : > { %487 = dma.vmem_to_hbm [thread:$0]  (%p733_p3), %s348_s12, 128, %s350_s13, %s332_s18  }
 0x133   : > { %v327_v21 = vpop.f32.mrf.mxu2 }
 0x134 PF: > { %p493_p9 = scmp.ge.s32.totalorder %s654_s22, 2  ;;  %s361_s30 = sand.u32 1, %s626_s15  }
 0x135   : > { %s362_s6 = scalar_lea.sflag [#allocation3], %s361_s30 }
 0x136   : > { %p490_p10 = pnand %p493_p9, %p742_p8 }
 0x138   : > { %p491_p11 = pneg %p490_p10 }
 0x13a   : > { %621 = dma.done.wait (%p491_p11), %s362_s6, 128  }
 0x13b   : > { %623 = vsyncadd (%p491_p11), %s362_s6, 4294967168  ;;  %s17_s22 = sadd.s32 1, %s654_s22   ;;  %s831_s28 = sld [smem:[#allocation5_spill]] }
 0x13c   : > { %p14_p12 = scmp.ge.s32.totalorder %s17_s22, 6   ;;  %s832_s15 = smov %s630_s16 }
 0x13d   : > { %s833_s16 = smov %s634_s17  ;;  %s834_s17 = smov %s751_s7 }
 0x13e   : > { %s835_s18 = smov %s646_s20  ;;  %s836_s19 = smov %s650_s21 }
 0x13f   : > { %s837_s20 = smov %s840_s25  ;;  %16 = sbr.rel (!%p14_p12) target bundleno = 5 (0x5), region = 77 }
 0x141   : > { %s838_s21 = smov %s831_s28 }
 0x144   :  { %368 = vsyncpa [#allocation3], 1 }
 0x145   :  { %370 = vsyncpa [#allocation3 + $0x1], 1 }

</bundles_post_ra>
